<compile_context>
chip_gen: v7x
topology: tpu7x:2x2x1
jax: 0.10.0
libtpu: 0.0.40
codegen_flags: <defaults>
</compile_context>

<pallas_src>
import numpy as np
import jax
import jax.numpy as jnp
from jax.experimental import pallas as pl
from jax.experimental.pallas import tpu as pltpu

d8_rev = [0, 1, 2, 5, 4, 3, 6, 7]


def _round_up(x, m):
    return (x + m - 1) // m * m


# ----------------------------------------------------------------------------
# Pallas kernel: one (batch, q-tile, channel-tile) step
# ----------------------------------------------------------------------------
def _gather_fill_kernel(hi_ref, mid_ref, lo_ref, gidx_ref, out_ref, onehot_ref):
    # hi/mid/lo : (TC, S)  bf16  — exact 3-way split of the f32 source table
    # gidx      : (1, TQ)  int32 — per-output-pixel source column (same for all C)
    # out       : (TC, TQ) f32   — one (channel, q) tile of the flattened NCHW map
    # onehot    : (S, TQ)  bf16  — VMEM scratch, built once per (batch, q-tile)

    # Channel-tile axis (program_id(2)) is innermost and "arbitrary", so every
    # core that owns a (b, qt) point runs ct == 0 first: the scratch is always
    # initialized before reuse, even under megacore sharding.
    @pl.when(pl.program_id(2) == 0)
    def _build_onehot():
        s, tq = onehot_ref.shape
        g = gidx_ref[...]                                            # (1, TQ)
        iota = jax.lax.broadcasted_iota(jnp.int32, (s, tq), 0)       # (S, TQ)
        onehot_ref[...] = (iota == g).astype(onehot_ref.dtype)

    oh = onehot_ref[...]
    # Three single-pass bf16 MXU dots with f32 accumulation: each column of the
    # one-hot has exactly one 1.0, so the selection is exact; hi+mid+lo restores
    # the original f32 value (<= 1 ulp).
    acc = jnp.dot(hi_ref[...], oh, preferred_element_type=jnp.float32)
    acc = acc + jnp.dot(mid_ref[...], oh, preferred_element_type=jnp.float32)
    acc = acc + jnp.dot(lo_ref[...], oh, preferred_element_type=jnp.float32)
    out_ref[...] = acc.astype(out_ref.dtype)


# ----------------------------------------------------------------------------
# Host-side glue
# ----------------------------------------------------------------------------
def _split_f32_to_bf16_terms(x):
    """Exact 3-way bf16 decomposition of an f32 array: hi + mid + lo == x."""
    x = x.astype(jnp.float32)
    hi = x.astype(jnp.bfloat16)
    r1 = x - hi.astype(jnp.float32)
    mid = r1.astype(jnp.bfloat16)
    r2 = r1 - mid.astype(jnp.float32)
    lo = r2.astype(jnp.bfloat16)
    return hi, mid, lo


def _build_gather_index(src_idx, d8_apply, *, B, H, W, FS, dummy_index, q_pad):
    """gidx[b, oy*W*FS + ox] = src*FS*FS + qy*FS + qx, or dummy_index (background).
    Mirrors torch_d8_transform: out[py,px] = m[qy,qx] with
      yy = FS-1-py if d8&4 else py ; xx = FS-1-px if d8&2 else px
      (qy,qx) = (xx,yy) if d8&1 else (yy,xx)"""
    src = src_idx.reshape(B, H, W).astype(jnp.int32)
    d8 = d8_apply.reshape(B, H, W).astype(jnp.int32)
    valid = (d8 >= 0)[..., None, None]
    d8c = jnp.maximum(d8, 0)[..., None, None]                        # (B,H,W,1,1)
    py = jnp.arange(FS, dtype=jnp.int32)[:, None]                    # (FS,1)
    px = jnp.arange(FS, dtype=jnp.int32)[None, :]                    # (1,FS)
    yy = jnp.where((d8c & 4) != 0, FS - 1 - py, py)
    xx = jnp.where((d8c & 2) != 0, FS - 1 - px, px)
    swap = (d8c & 1) != 0
    qy = jnp.where(swap, xx, yy)
    qx = jnp.where(swap, yy, xx)
    g = src[..., None, None] * (FS * FS) + qy * FS + qx              # (B,H,W,FS,FS)
    g = jnp.where(valid, g, dummy_index)
    # (B,H,W,FS,FS) -> (B,H,FS,W,FS) -> (B,1,Hp*Wp); tiny int32 array.
    g = jnp.transpose(g, (0, 1, 3, 2, 4)).reshape(B, 1, H * FS * W * FS)
    if q_pad > g.shape[-1]:
        pad = jnp.full((B, 1, q_pad - g.shape[-1]), dummy_index, dtype=jnp.int32)
        g = jnp.concatenate([g, pad], axis=-1)
    return g.astype(jnp.int32)


def _tile_vmem_bytes(TC, TQ, S):
    # double-buffered (3 bf16 table tiles + int32 gidx + f32 out) + one-hot scratch
    per_step = 3 * TC * S * 2 + TQ * 4 + TC * TQ * 4
    return 2 * per_step + S * TQ * 2


def rearranged_features_map(features, src_idx, d8_apply, backend_feature,
                            *, H, W, FS, c_tile=None, q_tile=2048,
                            vmem_budget_bytes=40 * 1024 * 1024):
    """features: (B, N, C, fs, fs) float32 (PyTorch layout)
       src_idx : int32[B*H*W] source feature index per target cell (clamped >= 0)
       d8_apply: int32[B*H*W] d8 code to apply per cell, -1 if empty
       backend_feature: (1, C, 1, 1) background ("dummy") feature.
       Returns (B, C, H*fs, W*fs) matching the PyTorch forward output."""
    B, N, C, fs, _ = features.shape
    assert fs == FS
    Hp, Wp = H * FS, W * FS
    Q = Hp * Wp
    NP = N * FS * FS
    # Contraction depth: flattened patches + >=1 background column, padded only to
    # a multiple of 16 (not 128) so the MXU carries no junk contraction work.
    # dummy_index = NP; all columns [NP, S) hold the background feature.
    S = _round_up(NP + 1, 16)

    # Channel tile (MXU M dim): 256 matches the v6e/v7x 256-wide MXU, 128 is the
    # v5e native tile; tiny C collapses to one block (fewest grid steps).
    if c_tile is not None and C % c_tile == 0:
        TC = c_tile
    elif C <= 256:
        TC = C
    elif C % 256 == 0:
        TC = 256
    elif C % 128 == 0:
        TC = 128
    else:
        TC = C

    # Spatial tile (lanes): multiple of 128, as large as the VMEM budget allows.
    cap = min(_round_up(q_tile, 128), _round_up(Q, 128))
    TQ = cap
    while TQ > 128 and _tile_vmem_bytes(TC, TQ, S) > vmem_budget_bytes:
        TQ = max(128, ((TQ // 2) // 128) * 128)
    Qpad = _round_up(Q, TQ)

    # Source table (B, C, S) f32 -> exact 3-way bf16 split (small host relayout).
    flat = jnp.transpose(features.astype(jnp.float32).reshape(B, N, C, FS * FS),
                         (0, 2, 1, 3)).reshape(B, C, NP)
    bg = jnp.broadcast_to(backend_feature.reshape(1, C, 1).astype(jnp.float32),
                          (B, C, S - NP))
    table = jnp.concatenate([flat, bg], axis=-1)                     # (B, C, S)
    t_hi, t_mid, t_lo = _split_f32_to_bf16_terms(table)

    gidx = _build_gather_index(src_idx, d8_apply, B=B, H=H, W=W, FS=FS,
                               dummy_index=NP, q_pad=Qpad)           # (B, 1, Qpad)

    grid = (B, Qpad // TQ, C // TC)
    tab_spec = pl.BlockSpec((None, TC, S), lambda b, qt, ct: (b, ct, 0))
    vmem_limit = int(max(_tile_vmem_bytes(TC, TQ, S) + (8 << 20), 32 << 20))

    out3 = pl.pallas_call(
        _gather_fill_kernel,
        out_shape=jax.ShapeDtypeStruct((B, C, Qpad), jnp.float32),
        grid=grid,
        in_specs=[
            tab_spec, tab_spec, tab_spec,
            # gather index: block depends only on (b, qt) -> fetched once per q-tile
            pl.BlockSpec((None, 1, TQ), lambda b, qt, ct: (b, 0, qt)),
        ],
        out_specs=pl.BlockSpec((None, TC, TQ), lambda b, qt, ct: (b, ct, qt)),
        scratch_shapes=[pltpu.VMEM((S, TQ), jnp.bfloat16)],
        compiler_params=pltpu.CompilerParams(
            dimension_semantics=("parallel", "parallel", "arbitrary"),
            vmem_limit_bytes=vmem_limit),
        cost_estimate=pl.CostEstimate(
            flops=6 * B * C * S * Qpad,
            transcendentals=0,
            bytes_accessed=(3 * 2 * B * (Qpad // TQ) * C * S
                            + 4 * B * Qpad + 4 * B * C * Qpad)),
    )(t_hi, t_mid, t_lo, gidx)

    if Qpad != Q:
        out3 = out3[:, :, :Q]
    # Free reshape: flattened spatial -> (Hp, Wp); output already in NCHW layout.
    return out3.reshape(B, C, Hp, Wp).astype(features.dtype)


# ----------------------------------------------------------------------------
# Host-side (simplified) rearrangement — replaces RearrangedFeaturesMap.rearrange
# ----------------------------------------------------------------------------
def simplified_rearrange(ys, xs, *, H, W):
    # TODO(synk): the original rearrange() is a stochastic search driven by
    # cv2.floodFill / cv2.connectedComponents / cv2.distanceTransform and
    # random.randint; it has no Pallas (or even pure-JAX) equivalent.  We emit a
    # deterministic valid placement (same data structure fill_features consumes).
    B, N = ys.shape
    src_idx = np.zeros((B, H, W), dtype=np.int32)      # clamped: safe index
    d8_apply = np.full((B, H, W), -1, dtype=np.int32)  # -1 => background cell
    for b in range(B):
        r_mask = ys[b] > -1
        valid = np.where(r_mask)[0]
        for n, src in enumerate(valid):
            ty, tx = n // W, n % W
            d8 = (b * 3 + n) % 8
            src_idx[b, ty, tx] = src
            d8_apply[b, ty, tx] = d8_rev[d8]           # fill_features applies d8_rev[d8]
    return jnp.asarray(src_idx.reshape(-1)), jnp.asarray(d8_apply.reshape(-1))


# ----------------------------------------------------------------------------
# numpy reference mirroring fill_features() semantics
# ----------------------------------------------------------------------------
def _np_d8_transform(m, d8):
    if d8 & 1:
        m = np.swapaxes(m, -2, -1)
    if d8 & 2:
        m = m[..., ::-1]
    if d8 & 4:
        m = m[..., ::-1, :]
    return m


def reference_fill(features, src_idx, d8_apply, backend_feature, *, H, W, FS):
    B, N, C, fs, _ = features.shape
    f_map = np.broadcast_to(backend_feature.reshape(1, C, 1, 1),
                            (B, C, H * FS, W * FS)).copy()
    src_idx = src_idx.reshape(B, H, W)
    d8_apply = d8_apply.reshape(B, H, W)
    for b in range(B):
        for i in range(H):
            for j in range(W):
                d8 = d8_apply[b, i, j]
                if d8 < 0:
                    continue
                f = _np_d8_transform(features[b, src_idx[b, i, j]], d8)
                f_map[b, :, i * FS:(i + 1) * FS, j * FS:(j + 1) * FS] = f
    return f_map


# ----------------------------------------------------------------------------
if __name__ == "__main__":
    # small but TPU-friendly: C=256 (one 256-wide channel block), spatial 16x16
    B, N, C, FS, H, W = 2, 8, 256, 2, 8, 8

    key = jax.random.PRNGKey(0)
    features = jax.random.normal(key, (B, N, C, FS, FS), dtype=jnp.float32)

    # ys/xs with -1 padding (module input convention), deterministic distinct cells
    ys_np = np.full((B, N), -1, dtype=np.int32)
    xs_np = np.full((B, N), -1, dtype=np.int32)
    for b in range(B):
        nv = 5 + b
        cells = [(k * 3) % (H * W) for k in range(nv)]     # distinct
        ys_np[b, :nv] = np.array(cells, dtype=np.int32) // W + 2
        xs_np[b, :nv] = np.array(cells, dtype=np.int32) % W + 3

    # __init__ uses torch.full((1, C, 1, 1), 0); use a non-zero constant so the
    # background-fill path is observable.
    backend_feature = jnp.full((1, C, 1, 1), 0.25, dtype=jnp.float32)

    src_idx, d8_apply = simplified_rearrange(ys_np, xs_np, H=H, W=W)

    out = rearranged_features_map(features, src_idx, d8_apply, backend_feature,
                                  H=H, W=W, FS=FS)
    out = jax.block_until_ready(out)

    ref = reference_fill(np.asarray(features), np.asarray(src_idx),
                         np.asarray(d8_apply), np.asarray(backend_feature),
                         H=H, W=W, FS=FS)
    np.testing.assert_allclose(np.asarray(out), ref, rtol=1e-6, atol=1e-6)

    print("KERNEL_OK")
</pallas_src>

<mosaic_0001>
module attributes {stable_mosaic.version = 11 : i64} {
  func.func @_gather_fill_kernel(%arg0: i32, %arg1: i32, %arg2: i32, %arg3: memref<1x256x48xbf16, #tpu.memory_space<vmem>>, %arg4: memref<1x256x48xbf16, #tpu.memory_space<vmem>>, %arg5: memref<1x256x48xbf16, #tpu.memory_space<vmem>>, %arg6: memref<1x1x256xi32, #tpu.memory_space<vmem>>, %arg7: memref<1x256x256xf32, #tpu.memory_space<vmem>>, %arg8: memref<48x256xbf16, #tpu.memory_space<vmem>>) attributes {dimension_semantics = [#tpu.dimension_semantics<parallel>, #tpu.dimension_semantics<parallel>, #tpu.dimension_semantics<arbitrary>], iteration_bounds = array<i64: 2, 1, 1>, scalar_prefetch = 0 : i64, scratch_operands = 1 : i64, tpu.core_type = #tpu.core_type<tc>, window_params = [{transform_indices = @transform_0, window_bounds = array<i64: 1, 256, 48>}, {transform_indices = @transform_1, window_bounds = array<i64: 1, 256, 48>}, {transform_indices = @transform_2, window_bounds = array<i64: 1, 256, 48>}, {transform_indices = @transform_3, window_bounds = array<i64: 1, 1, 256>}, {transform_indices = @transform_4, window_bounds = array<i64: 1, 256, 256>}]} {
    %c0_i32 = arith.constant 0 : i32
    %0 = arith.cmpi eq, %arg2, %c0_i32 : i32
    %1 = arith.extui %0 : i1 to i32
    %c0_i32_0 = arith.constant 0 : i32
    %2 = arith.cmpi ne, %1, %c0_i32_0 : i32
    scf.if %2 {
      %c0_16 = arith.constant 0 : index
      %c0_17 = arith.constant 0 : index
      %c0_18 = arith.constant 0 : index
      %18 = vector.load %arg6[%c0_16, %c0_17, %c0_18] : memref<1x1x256xi32, #tpu.memory_space<vmem>>, vector<1x1x256xi32>
      %19 = vector.shape_cast %18 : vector<1x1x256xi32> to vector<1x256xi32>
      %20 = tpu.iota {dimensions = array<i32: 0>} : vector<48x256xi32>
      %21 = vector.broadcast %19 : vector<1x256xi32> to vector<48x256xi32>
      %22 = arith.cmpi eq, %20, %21 : vector<48x256xi32>
      %23 = arith.extui %22 : vector<48x256xi1> to vector<48x256xi32>
      %24 = arith.sitofp %23 : vector<48x256xi32> to vector<48x256xf32>
      %25 = arith.truncf %24 : vector<48x256xf32> to vector<48x256xbf16>
      %c0_19 = arith.constant 0 : index
      %c0_20 = arith.constant 0 : index
      %26 = vector.load %arg8[%c0_19, %c0_20] : memref<48x256xbf16, #tpu.memory_space<vmem>>, vector<48x256xbf16>
      tpu.vector_store %arg8[%c0_19, %c0_20], %25 {strides = array<i32>} : memref<48x256xbf16, #tpu.memory_space<vmem>>, vector<48x256xbf16>,
    } else {
    }
    %c0 = arith.constant 0 : index
    %c0_1 = arith.constant 0 : index
    %3 = vector.load %arg8[%c0, %c0_1] : memref<48x256xbf16, #tpu.memory_space<vmem>>, vector<48x256xbf16>
    %c0_2 = arith.constant 0 : index
    %c0_3 = arith.constant 0 : index
    %c0_4 = arith.constant 0 : index
    %4 = vector.load %arg3[%c0_2, %c0_3, %c0_4] : memref<1x256x48xbf16, #tpu.memory_space<vmem>>, vector<1x256x48xbf16>
    %5 = vector.shape_cast %4 : vector<1x256x48xbf16> to vector<256x48xbf16>
    %cst = arith.constant dense<0.000000e+00> : vector<256x256xf32>
    %6 = tpu.matmul %5, %3, %cst {dimension_numbers = #tpu.dot_dimension_numbers<[1], [0], [0], [1], [0, 0, 1, 1], [], []>} : vector<256x48xbf16>, vector<48x256xbf16>, vector<256x256xf32> -> vector<256x256xf32>
    %c0_5 = arith.constant 0 : index
    %c0_6 = arith.constant 0 : index
    %c0_7 = arith.constant 0 : index
    %7 = vector.load %arg4[%c0_5, %c0_6, %c0_7] : memref<1x256x48xbf16, #tpu.memory_space<vmem>>, vector<1x256x48xbf16>
    %8 = vector.shape_cast %7 : vector<1x256x48xbf16> to vector<256x48xbf16>
    %cst_8 = arith.constant dense<0.000000e+00> : vector<256x256xf32>
    %9 = tpu.matmul %8, %3, %cst_8 {dimension_numbers = #tpu.dot_dimension_numbers<[1], [0], [0], [1], [0, 0, 1, 1], [], []>} : vector<256x48xbf16>, vector<48x256xbf16>, vector<256x256xf32> -> vector<256x256xf32>
    %10 = arith.addf %6, %9 : vector<256x256xf32>
    %c0_9 = arith.constant 0 : index
    %c0_10 = arith.constant 0 : index
    %c0_11 = arith.constant 0 : index
    %11 = vector.load %arg5[%c0_9, %c0_10, %c0_11] : memref<1x256x48xbf16, #tpu.memory_space<vmem>>, vector<1x256x48xbf16>
    %12 = vector.shape_cast %11 : vector<1x256x48xbf16> to vector<256x48xbf16>
    %cst_12 = arith.constant dense<0.000000e+00> : vector<256x256xf32>
    %13 = tpu.matmul %12, %3, %cst_12 {dimension_numbers = #tpu.dot_dimension_numbers<[1], [0], [0], [1], [0, 0, 1, 1], [], []>} : vector<256x48xbf16>, vector<48x256xbf16>, vector<256x256xf32> -> vector<256x256xf32>
    %14 = arith.addf %10, %13 : vector<256x256xf32>
    %c0_13 = arith.constant 0 : index
    %c0_14 = arith.constant 0 : index
    %c0_15 = arith.constant 0 : index
    %15 = vector.load %arg7[%c0_13, %c0_14, %c0_15] : memref<1x256x256xf32, #tpu.memory_space<vmem>>, vector<1x256x256xf32>
    %16 = vector.shape_cast %15 : vector<1x256x256xf32> to vector<256x256xf32>
    %17 = vector.shape_cast %14 : vector<256x256xf32> to vector<1x256x256xf32>
    tpu.vector_store %arg7[%c0_13, %c0_14, %c0_15], %17 {strides = array<i32>} : memref<1x256x256xf32, #tpu.memory_space<vmem>>, vector<1x256x256xf32>,
    return
  }
  func.func @transform_0(%arg0: i32, %arg1: i32, %arg2: i32) -> (i32, i32, i32) {
    %c0_i32 = arith.constant 0 : i32
    %c0_i32_0 = arith.constant 0 : i32
    return %arg0, %arg2, %c0_i32 : i32, i32, i32
  }
  func.func @transform_1(%arg0: i32, %arg1: i32, %arg2: i32) -> (i32, i32, i32) {
    %c0_i32 = arith.constant 0 : i32
    %c0_i32_0 = arith.constant 0 : i32
    return %arg0, %arg2, %c0_i32 : i32, i32, i32
  }
  func.func @transform_2(%arg0: i32, %arg1: i32, %arg2: i32) -> (i32, i32, i32) {
    %c0_i32 = arith.constant 0 : i32
    %c0_i32_0 = arith.constant 0 : i32
    return %arg0, %arg2, %c0_i32 : i32, i32, i32
  }
  func.func @transform_3(%arg0: i32, %arg1: i32, %arg2: i32) -> (i32, i32, i32) {
    %c0_i32 = arith.constant 0 : i32
    %c0_i32_0 = arith.constant 0 : i32
    return %arg0, %c0_i32, %arg1 : i32, i32, i32
  }
  func.func @transform_4(%arg0: i32, %arg1: i32, %arg2: i32) -> (i32, i32, i32) {
    %c0_i32 = arith.constant 0 : i32
    return %arg0, %arg2, %arg1 : i32, i32, i32
  }
}

</mosaic_0001>

<bundles_post_ra>
// kernel: tpu_custom_call.1
= control target key start
LH: loop header
LB: loop body
LE: loop exit
PB: predicated region body
PF: predicated region fallthrough
CT: control target
= control target key end

     0   :  { %9 = vsyncpa [#allocation4], 0  ;;  %s2752_s0 = inlined_call_operand.vmem [shape: bf16[2,256,48], index: 0, kind: input, shape index: {}]   ;;  %s2753_s1 = inlined_call_operand.vmem [shape: bf16[2,256,48], index: 1, kind: input, shape index: {}]   ;;  %s2754_s2 = inlined_call_operand.vmem [shape: bf16[2,256,48], index: 2, kind: input, shape index: {}]   ;;  %s2755_s3 = inlined_call_operand.vmem [shape: s32[2,1,256], index: 3, kind: input, shape index: {}]   ;;  %s2756_s4 = inlined_call_operand.hbm [shape: f32[2,256,256], index: 4, kind: output, shape index: {}]  }
   0x1   :  { %11 = vsyncpa [#allocation4 + $0x1], 0  ;;  %s2276_s15 = smov 0   ;;  %s2278_s16 = smov 0  }
   0x2   :  { %s2280_s17 = smov 0   ;;  %s2282_s18 = smov 0  }
   0x3   :  { %s2284_s19 = smov 0   ;;  %s2286_s20 = smov 0  }
   0x4 LB: > { %s1759_s21 = sadd.s32 4294967295, %s2244_s20   ;;  %s1760_s22 = sadd.s32 4294967294, %s2244_s20   ;;  %s2244_s20 = sphi %s2286_s20, %s17_s20   ;;  %s2240_s19 = sphi %s2284_s19, %s2775_s19   ;;  %s2236_s18 = sphi %s2282_s18, %s2774_s18   ;;  %s2232_s17 = sphi %s2280_s17, %s2773_s17   ;;  %s2228_s16 = sphi %s2278_s16, %s2772_s16   ;;  %s2224_s15 = sphi %s2276_s15, %s2771_s15  }
   0x5   : > { %s36_s23 = sadd.s32 1, %s2240_s19  ;;  %s159_s24 = sadd.s32 1, %s2232_s17 }
   0x6   : > { %p38_p0 = scmp.ge.s32.totalorder %s36_s23, 2  ;;  %p169_p1 = scmp.ne.s32.totalorder %s2232_s17, %s2228_s16 }
   0x7   : > { %p170_p2 = scmp.eq.s32.totalorder %s1759_s21, 1  ;;  %p175_p3 = scmp.ne.s32.totalorder %s2228_s16, %s2224_s15 }
   0x8   : > { %s2777_s23 = smov (%p38_p0, %s36_s23), 0  ;;  %p176_p5 = scmp.eq.s32.totalorder %s1760_s22, 1 }
   0x9   : > { %p2316_p4 = por %p170_p2, %p169_p1  ;;  %s152_s26 = ssub.s32 %s2240_s19, %s2777_s23 }
   0xa   : > { %p1763_p6 = scmp.ge.s32.totalorder %s2244_s20, 1  ;;  %p157_p7 = scmp.eq.s32.totalorder %s152_s26, 0 }
   0xb   : > { %p2323_p8 = por %p176_p5, %p175_p3  ;;  %p245_p9 = scmp.lt.s32.totalorder %s2244_s20, 3 }
   0xc   : > { %s2329_s28 = scalar_select %p157_p7, %s2232_s17, %s159_s24  }
   0xd   : > { %p246_p10 = pnand %p1763_p6, %p245_p9 }
   0xe   : > { %p302_p11 = scmp.lt.s32.totalorder (!%p246_p10), %s2236_s18, 1  ;;  %v348_v0 = vlaneseq (!%p246_p10)  ;;  %v2246_v1 = vmov (!%p246_p10), 0   ;;  %v2247_v14 = vmov (!%p246_p10), 1.0|1.0   ;;  %s298_s26 = sand.u32 (!%p246_p10), 1, %s2228_s16  }
   0xf   : > { %249 = sbr.rel (%p246_p10) target bundleno = 460 (0x1cc), region = 36  ;;  %642 = vmatprep.mubr.bf16.mxu1 (!%p246_p10), %v2246_v1  ;;  %963 = vmatprep.mubr.bf16.mxu0 (!%p246_p10), %v2246_v1 }
  0x10   : > { %v349_v2 = vshrl.u32 (!%p246_p10), %v348_v0, 7 }
  0x12   : > { %v361_v3 = vsub.s32 (!%p246_p10), 1, %v349_v2  ;;  %v357_v4 = vsub.s32 (!%p246_p10), 0, %v349_v2  ;;  %v350_v5 = vadd.s32 (!%p246_p10), 8, %v349_v2  ;;  %v351_v6 = vadd.s32 (!%p246_p10), 16, %v349_v2 }
  0x13   : > { %v352_v7 = vadd.s32 (!%p246_p10), 24, %v349_v2  ;;  %v353_v11 = vadd.s32 (!%p246_p10), 32, %v349_v2  ;;  %v354_v12 = vadd.s32 (!%p246_p10), 40, %v349_v2 }
  0x16   : > { %s303_s29 = scalar_select %p302_p11, %s2236_s18, 1 }
  0x18   : > { %s2335_s30 = sshll.u32 %s303_s29, 7  ;;  %s1771_s5 = sshll.u32 %s303_s29, 1 }
  0x19   : > { %s2341_s8 = scalar_lea.vmem %s2753_s1, %s2335_s30  ;;  %s2347_s11 = scalar_lea.vmem %s2752_s0, %s2335_s30 }
  0x1a   : > { %s338_s14 = scalar_lea.vmem %s2755_s3, %s1771_s5  ;;  %v2118_v20 = vld [vmem:[%s2341_s8] sm:$0xff]   ;;  %s2410_s24 = scalar_lea.vmem %s2754_s2, %s2335_s30  ;;  %v2120_v22 = vld [vmem:[%s2341_s8 + $0x8] sm:$0xff]   ;;  %v2122_v24 = vld [vmem:[%s2341_s8 + $0x10] sm:$0xff]  }
  0x1b   : > { %v347_v8 = vld [vmem:[%s338_s14] sm:$0x3]  ;;  %v2121_v23 = vld [vmem:[%s2347_s11 + $0x8] sm:$0xff]   ;;  %v2123_v25 = vld [vmem:[%s2347_s11 + $0x10] sm:$0xff]   ;;  %s1764_s29 = sshll.u32 %s298_s26, 9  ;;  %s1888_s5 = sshll.u32 %s2236_s18, 13 }
  0x1c   : > { %v362_v9 = vrot.slane %v347_v8, %v361_v3  ;;  %v358_v10 = vrot.slane %v347_v8, %v357_v4  ;;  %v2119_v21 = vld [vmem:[%s2347_s11] sm:$0xff]   ;;  %v2124_v26 = vld [vmem:[%s2341_s8 + $0x18] sm:$0xff]   ;;  %v2128_v30 = vld [vmem:[%s2341_s8 + $0x28] sm:$0xff]   ;;  %s2611_s30 = scalar_lea.vmem [#allocation3], %s1764_s29  ;;  %s2697_s9 = scalar_lea.hbm %s2756_s4, %s1888_s5 }
  0x1d   : > { %v2125_v27 = vld [vmem:[%s2347_s11 + $0x18] sm:$0xff]   ;;  %v2126_v28 = vld [vmem:[%s2341_s8 + $0x20] sm:$0xff]   ;;  %v2129_v31 = vld [vmem:[%s2347_s11 + $0x28] sm:$0xff]   ;;  %s1624_s6 = sshll.u32 %s2611_s30, 4  ;;  %s2706_s18 = scalar_lea.sflag [#allocation4], %s298_s26  ;;  %s2699_s6 = int_to_ptr.vmem [resolvable:$true] %s1624_s6 }
  0x1e   : > { %vm364_vm0 = vcmp.eq.s32.totalorder %v349_v2, %v362_v9  ;;  %vm366_vm1 = vcmp.eq.s32.totalorder %v350_v5, %v362_v9  ;;  %vm363_vm2 = vcmp.eq.s32.totalorder %v349_v2, %v358_v10  ;;  %vm365_vm3 = vcmp.eq.s32.totalorder %v350_v5, %v358_v10  ;;  %v2127_v29 = vld [vmem:[%s2347_s11 + $0x20] sm:$0xff]   ;;  %v2130_v32 = vld [vmem:[%s2341_s8 + $0x30] sm:$0xff]   ;;  %v2132_v34 = vld [vmem:[%s2341_s8 + $0x38] sm:$0xff]   ;;  %s2166_s10 = scalar_lea.vmem %s2699_s6, 8192 }
  0x1f   : > { %vm2352_vm4 = vmpackc.low %vm366_vm1, %vm364_vm0  ;;  %vm368_vm5 = vcmp.eq.s32.totalorder %v351_v6, %v362_v9  ;;  %vm370_vm6 = vcmp.eq.s32.totalorder %v352_v7, %v362_v9  ;;  %vm367_vm7 = vcmp.eq.s32.totalorder %v351_v6, %v358_v10  ;;  %vm369_vm8 = vcmp.eq.s32.totalorder %v352_v7, %v358_v10  ;;  %v2131_v33 = vld [vmem:[%s2347_s11 + $0x30] sm:$0xff]   ;;  %v2133_v35 = vld [vmem:[%s2347_s11 + $0x38] sm:$0xff]   ;;  %p2167_p12 = scmp.ne.s32.totalorder %s2699_s6, %s2166_s10 }
  0x20   : > { %1890 = vmatprep.subr.msk.bf16.mxu1 %vm2352_vm4, %v2247_v14  ;;  %1902 = vmatprep.subr.msk.bf16.mxu0 %vm2352_vm4, %v2247_v14  ;;  %vm2360_vm9 = vmpackc.low %vm365_vm3, %vm363_vm2  ;;  %vm372_vm10 = vcmp.eq.s32.totalorder %v353_v11, %v362_v9  ;;  %vm374_vm11 = vcmp.eq.s32.totalorder %v354_v12, %v362_v9  ;;  %vm371_vm15 = vcmp.eq.s32.totalorder %v353_v11, %v358_v10  ;;  %vm561_vm2 = vcmask 392192   ;;  %v2134_v36 = vld [vmem:[%s2341_s8 + $0x40] sm:$0xff]   ;;  %v2136_v38 = vld [vmem:[%s2341_s8 + $0x48] sm:$0xff]  }
  0x21   : > { %1892 = vmatpush1.bf16.msk.msra.mxu1 %vm2360_vm9, %v2247_v14  ;;  %1904 = vmatpush1.bf16.msk.msra.mxu0 %vm2360_vm9, %v2247_v14  ;;  %vm2368_vm12 = vmpackc.low %vm370_vm6, %vm368_vm5  ;;  %vm373_vm0 = vcmp.eq.s32.totalorder %v354_v12, %v358_v10  ;;  %v2135_v37 = vld [vmem:[%s2410_s24] sm:$0xff]   ;;  %v2137_v39 = vld [vmem:[%s2410_s24 + $0x8] sm:$0xff]   ;;  %p2168_p13 = pnand %p2167_p12, %p2316_p4 }
  0x22   : > { %1894 = vmatprep.subr.msk.bf16.mxu1 %vm2368_vm12, %v2247_v14  ;;  %1906 = vmatprep.subr.msk.bf16.mxu0 %vm2368_vm12, %v2247_v14  ;;  %vm2376_vm13 = vmpackc.low %vm369_vm8, %vm367_vm7  ;;  %v2138_v40 = vld [vmem:[%s2341_s8 + $0x50] sm:$0xff]   ;;  %v2140_v42 = vld [vmem:[%s2341_s8 + $0x58] sm:$0xff]  }
  0x23   : > { %vm2380_vm14 = vmpackc.low %vm374_vm11, %vm372_vm10  ;;  %v2139_v41 = vld [vmem:[%s2410_s24 + $0x10] sm:$0xff]   ;;  %v2141_v43 = vld [vmem:[%s2410_s24 + $0x18] sm:$0xff]   ;;  %p2169_p0 = pneg %p2168_p13 }
  0x24   : > { %vm2392_vm1 = vmpackc.low %vm373_vm0, %vm371_vm15  ;;  %v2142_v44 = vld [vmem:[%s2341_s8 + $0x60] sm:$0xff]   ;;  %v2144_v46 = vld [vmem:[%s2341_s8 + $0x68] sm:$0xff]  }
  0x25   : > { %1896 = vmatpush1.bf16.msk.msra.mxu1 %vm2376_vm13, %v2247_v14  ;;  %1908 = vmatpush1.bf16.msk.msra.mxu0 %vm2376_vm13, %v2247_v14  ;;  %v2143_v45 = vld [vmem:[%s2410_s24 + $0x20] sm:$0xff]   ;;  %v2145_v47 = vld [vmem:[%s2410_s24 + $0x28] sm:$0xff]   ;;  %v2146_v48 = vld [vmem:[%s2341_s8 + $0x70] sm:$0xff]  }
  0x26   : > { %1898 = vmatprep.subr.msk.bf16.mxu1 %vm2380_vm14, %v2247_v14  ;;  %1910 = vmatprep.subr.msk.bf16.mxu0 %vm2380_vm14, %v2247_v14  ;;  %v2147_v49 = vld [vmem:[%s2410_s24 + $0x30] sm:$0xff]   ;;  %v2148_v50 = vld [vmem:[%s2341_s8 + $0x78] sm:$0xff]   ;;  %v2150_v52 = vld [vmem:[%s2347_s11 + $0x40] sm:$0xff]  }
  0x27   : > { %v2149_v51 = vld [vmem:[%s2410_s24 + $0x38] sm:$0xff]   ;;  %v2151_v53 = vld [vmem:[%s2410_s24 + $0x40] sm:$0xff]   ;;  %v2152_v54 = vld [vmem:[%s2347_s11 + $0x48] sm:$0xff]  }
  0x28   : > { %v2153_v55 = vld [vmem:[%s2410_s24 + $0x48] sm:$0xff]   ;;  %v2154_v56 = vld [vmem:[%s2347_s11 + $0x50] sm:$0xff]   ;;  %v2156_v58 = vld [vmem:[%s2347_s11 + $0x58] sm:$0xff]  }
  0x29   : > { %1900 = vmatpush1.bf16.msk.msra.mxu1 %vm2392_vm1, %v2247_v14  ;;  %1912 = vmatpush1.bf16.msk.msra.mxu0 %vm2392_vm1, %v2247_v14  ;;  %v2155_v57 = vld [vmem:[%s2410_s24 + $0x50] sm:$0xff]   ;;  %v2157_v59 = vld [vmem:[%s2410_s24 + $0x58] sm:$0xff]   ;;  %v2158_v60 = vld [vmem:[%s2347_s11 + $0x60] sm:$0xff]  }
  0x2a   : > { %1925 = vmatprep.subr.msk.bf16.mxu1 %vm2352_vm4, %v2247_v14  ;;  %1914 = vmatprep.subr.msk.bf16.mxu0 %vm2352_vm4, %v2247_v14  ;;  %v2159_v61 = vld [vmem:[%s2410_s24 + $0x60] sm:$0xff]   ;;  %v2160_v62 = vld [vmem:[%s2347_s11 + $0x68] sm:$0xff]   ;;  %v2162_v0 = vld [vmem:[%s2347_s11 + $0x70] sm:$0xff]  }
  0x2b   : > { %v2161_v63 = vld [vmem:[%s2410_s24 + $0x68] sm:$0xff]   ;;  %v2163_v2 = vld [vmem:[%s2410_s24 + $0x70] sm:$0xff]   ;;  %v2164_v3 = vld [vmem:[%s2347_s11 + $0x78] sm:$0xff]   ;;  %s2248_s11 = smov [#allocation3]  }
  0x2c   : > { %1800 = vmatmul.mubr.msk.bf16.vlgmr.msra.gmra.mrb[0].mxu1 %vm561_vm2, %v2118_v20  ;;  %1832 = vmatmul.mubr.msk.bf16.vlgmr.msra.gmra.mrb[0].mxu0 %vm561_vm2, %v2119_v21  ;;  %v2165_v4 = vld [vmem:[%s2410_s24 + $0x78] sm:$0xff]   ;;  %s2170_s12 = sshll.u32 %s2248_s11, 4  ;;  %s2171_s12 = int_to_ptr.vmem [resolvable:$false] %s2170_s12 }
  0x2d   : > { %1928 = vmatpush1.bf16.msk.msra.mxu1 %vm2360_vm9, %v2247_v14  ;;  %1916 = vmatpush1.bf16.msk.msra.mxu0 %vm2360_vm9, %v2247_v14  ;;  %s2172_s13 = scalar_lea.vmem %s2171_s12, 16384  ;;  %p2173_p1 = scmp.lt.s32.totalorder %s2699_s6, %s2171_s12 }
  0x2e   : > { %652 = vmatprep.mubr.bf16.mxu1 %v2246_v1  ;;  %973 = vmatprep.mubr.bf16.mxu0 %v2246_v1  ;;  %p2174_p2 = scmp.lt.s32.totalorder %s2172_s13, %s2166_s10 }
  0x2f   : > { %1918 = vmatprep.subr.msk.bf16.mxu0 %vm2368_vm12, %v2247_v14  ;;  %1926 = vmatprep.subr.msk.bf16.mxu1 %vm2368_vm12, %v2247_v14 }
  0x30   : > { %p2175_p3 = por %p2174_p2, %p2173_p1 }
  0x31   : > { %1920 = vmatpush1.bf16.msk.msra.mxu0 %vm2376_vm13, %v2247_v14  ;;  %1929 = vmatpush1.bf16.msk.msra.mxu1 %vm2376_vm13, %v2247_v14 }
  0x32   : > { %1922 = vmatprep.subr.msk.bf16.mxu0 %vm2380_vm14, %v2247_v14  ;;  %1927 = vmatprep.subr.msk.bf16.mxu1 %vm2380_vm14, %v2247_v14  ;;  %p2176_p5 = pnand %p2175_p3, %p2169_p0 }
  0x34   : > { %1801 = vmatmul.mubr.msk.bf16.gmra.mrb[4].mxu1 %vm561_vm2, %v2120_v22  ;;  %1833 = vmatmul.mubr.msk.bf16.gmra.mrb[4].mxu0 %vm561_vm2, %v2121_v23 }
  0x35   : > { %662 = vmatprep.mubr.bf16.mxu1 %v2246_v1  ;;  %983 = vmatprep.mubr.bf16.mxu0 %v2246_v1 }
  0x36   : > { %1924 = vmatpush1.bf16.msk.msra.mxu0 %vm2392_vm1, %v2247_v14  ;;  %1930 = vmatpush1.bf16.msk.msra.mxu1 %vm2392_vm1, %v2247_v14 }
  0x3c   : > { %1802 = vmatmul.mubr.msk.bf16.gmra.mrb[8].mxu1 %vm561_vm2, %v2122_v24  ;;  %1834 = vmatmul.mubr.msk.bf16.gmra.mrb[8].mxu0 %vm561_vm2, %v2123_v25 }
  0x3d   : > { %672 = vmatprep.mubr.bf16.mxu1 %v2246_v1  ;;  %993 = vmatprep.mubr.bf16.mxu0 %v2246_v1 }
  0x44   : > { %1803 = vmatmul.mubr.msk.bf16.gmra.mrb[12].mxu1 %vm561_vm2, %v2124_v26  ;;  %1835 = vmatmul.mubr.msk.bf16.gmra.mrb[12].mxu0 %vm561_vm2, %v2125_v27 }
  0x45   : > { %682 = vmatprep.mubr.bf16.mxu1 %v2246_v1  ;;  %1003 = vmatprep.mubr.bf16.mxu0 %v2246_v1 }
  0x4c   : > { %1804 = vmatmul.mubr.msk.bf16.gmra.mrb[16].mxu1 %vm561_vm2, %v2126_v28  ;;  %1836 = vmatmul.mubr.msk.bf16.gmra.mrb[16].mxu0 %vm561_vm2, %v2127_v29 }
  0x4d   : > { %692 = vmatprep.mubr.bf16.mxu1 %v2246_v1  ;;  %1013 = vmatprep.mubr.bf16.mxu0 %v2246_v1 }
  0x54   : > { %1805 = vmatmul.mubr.msk.bf16.gmra.mrb[20].mxu1 %vm561_vm2, %v2128_v30  ;;  %1837 = vmatmul.mubr.msk.bf16.gmra.mrb[20].mxu0 %vm561_vm2, %v2129_v31 }
  0x55   : > { %702 = vmatprep.mubr.bf16.mxu1 %v2246_v1  ;;  %1023 = vmatprep.mubr.bf16.mxu0 %v2246_v1 }
  0x5c   : > { %1806 = vmatmul.mubr.msk.bf16.gmra.mrb[24].mxu1 %vm561_vm2, %v2130_v32  ;;  %1838 = vmatmul.mubr.msk.bf16.gmra.mrb[24].mxu0 %vm561_vm2, %v2131_v33 }
  0x5d   : > { %712 = vmatprep.mubr.bf16.mxu1 %v2246_v1  ;;  %1033 = vmatprep.mubr.bf16.mxu0 %v2246_v1 }
  0x64   : > { %1807 = vmatmul.mubr.msk.bf16.gmra.mrb[28].mxu1 %vm561_vm2, %v2132_v34  ;;  %1839 = vmatmul.mubr.msk.bf16.gmra.mrb[28].mxu0 %vm561_vm2, %v2133_v35 }
  0x65   : > { %722 = vmatprep.mubr.bf16.mxu1 %v2246_v1  ;;  %1316 = vmatprep.mubr.bf16.mxu0 %v2246_v1 }
  0x6c   : > { %1808 = vmatmul.mubr.msk.bf16.gmra.mrb[32].mxu1 %vm561_vm2, %v2134_v36  ;;  %1864 = vmatmul.mubr.msk.bf16.vlgmr.msra.gmra.mrb[0].mxu0 %vm561_vm2, %v2135_v37 }
  0x6d   : > { %732 = vmatprep.mubr.bf16.mxu1 %v2246_v1  ;;  %1326 = vmatprep.mubr.bf16.mxu0 %v2246_v1 }
  0x74   : > { %1809 = vmatmul.mubr.msk.bf16.gmra.mrb[36].mxu1 %vm561_vm2, %v2136_v38  ;;  %1865 = vmatmul.mubr.msk.bf16.gmra.mrb[4].mxu0 %vm561_vm2, %v2137_v39 }
  0x75   : > { %742 = vmatprep.mubr.bf16.mxu1 %v2246_v1  ;;  %1336 = vmatprep.mubr.bf16.mxu0 %v2246_v1 }
  0x7c   : > { %1810 = vmatmul.mubr.msk.bf16.gmra.mrb[40].mxu1 %vm561_vm2, %v2138_v40  ;;  %1866 = vmatmul.mubr.msk.bf16.gmra.mrb[8].mxu0 %vm561_vm2, %v2139_v41 }
  0x7d   : > { %752 = vmatprep.mubr.bf16.mxu1 %v2246_v1  ;;  %1346 = vmatprep.mubr.bf16.mxu0 %v2246_v1 }
  0x84   : > { %1811 = vmatmul.mubr.msk.bf16.gmra.mrb[44].mxu1 %vm561_vm2, %v2140_v42  ;;  %1867 = vmatmul.mubr.msk.bf16.gmra.mrb[12].mxu0 %vm561_vm2, %v2141_v43 }
  0x85   : > { %762 = vmatprep.mubr.bf16.mxu1 %v2246_v1  ;;  %1356 = vmatprep.mubr.bf16.mxu0 %v2246_v1 }
  0x8c   : > { %1812 = vmatmul.mubr.msk.bf16.gmra.mrb[48].mxu1 %vm561_vm2, %v2142_v44  ;;  %1868 = vmatmul.mubr.msk.bf16.gmra.mrb[16].mxu0 %vm561_vm2, %v2143_v45 }
  0x8d   : > { %772 = vmatprep.mubr.bf16.mxu1 %v2246_v1  ;;  %1366 = vmatprep.mubr.bf16.mxu0 %v2246_v1 }
  0x94   : > { %1813 = vmatmul.mubr.msk.bf16.gmra.mrb[52].mxu1 %vm561_vm2, %v2144_v46  ;;  %1869 = vmatmul.mubr.msk.bf16.gmra.mrb[20].mxu0 %vm561_vm2, %v2145_v47 }
  0x95   : > { %782 = vmatprep.mubr.bf16.mxu1 %v2246_v1  ;;  %1376 = vmatprep.mubr.bf16.mxu0 %v2246_v1 }
  0x9c   : > { %1814 = vmatmul.mubr.msk.bf16.gmra.mrb[56].mxu1 %vm561_vm2, %v2146_v48  ;;  %1870 = vmatmul.mubr.msk.bf16.gmra.mrb[24].mxu0 %vm561_vm2, %v2147_v49 }
  0x9d   : > { %792 = vmatprep.mubr.bf16.mxu1 %v2246_v1  ;;  %1386 = vmatprep.mubr.bf16.mxu0 %v2246_v1 }
  0xa4   : > { %1815 = vmatmul.mubr.msk.bf16.gmra.mrb[60].mxu1 %vm561_vm2, %v2148_v50  ;;  %1871 = vmatmul.mubr.msk.bf16.gmra.mrb[28].mxu0 %vm561_vm2, %v2149_v51 }
  0xa5   : > { %1043 = vmatprep.mubr.bf16.mxu1 %v2246_v1  ;;  %1396 = vmatprep.mubr.bf16.mxu0 %v2246_v1 }
  0xac   : > { %1840 = vmatmul.mubr.msk.bf16.vlgmr.msra.gmra.mrb[32].mxu1 %vm561_vm2, %v2150_v52  ;;  %1872 = vmatmul.mubr.msk.bf16.gmra.mrb[32].mxu0 %vm561_vm2, %v2151_v53 }
  0xad   : > { %1053 = vmatprep.mubr.bf16.mxu1 %v2246_v1  ;;  %1406 = vmatprep.mubr.bf16.mxu0 %v2246_v1 }
  0xb4   : > { %1841 = vmatmul.mubr.msk.bf16.gmra.mrb[36].mxu1 %vm561_vm2, %v2152_v54  ;;  %1873 = vmatmul.mubr.msk.bf16.gmra.mrb[36].mxu0 %vm561_vm2, %v2153_v55 }
  0xb5   : > { %1063 = vmatprep.mubr.bf16.mxu1 %v2246_v1  ;;  %1416 = vmatprep.mubr.bf16.mxu0 %v2246_v1 }
  0xbc   : > { %1842 = vmatmul.mubr.msk.bf16.gmra.mrb[40].mxu1 %vm561_vm2, %v2154_v56  ;;  %1874 = vmatmul.mubr.msk.bf16.gmra.mrb[40].mxu0 %vm561_vm2, %v2155_v57 }
  0xbd   : > { %1073 = vmatprep.mubr.bf16.mxu1 %v2246_v1  ;;  %1426 = vmatprep.mubr.bf16.mxu0 %v2246_v1 }
  0xc4   : > { %1843 = vmatmul.mubr.msk.bf16.gmra.mrb[44].mxu1 %vm561_vm2, %v2156_v58  ;;  %1875 = vmatmul.mubr.msk.bf16.gmra.mrb[44].mxu0 %vm561_vm2, %v2157_v59 }
  0xc5   : > { %1083 = vmatprep.mubr.bf16.mxu1 %v2246_v1  ;;  %1436 = vmatprep.mubr.bf16.mxu0 %v2246_v1 }
  0xcc   : > { %1844 = vmatmul.mubr.msk.bf16.gmra.mrb[48].mxu1 %vm561_vm2, %v2158_v60  ;;  %1876 = vmatmul.mubr.msk.bf16.gmra.mrb[48].mxu0 %vm561_vm2, %v2159_v61 }
  0xcd   : > { %1093 = vmatprep.mubr.bf16.mxu1 %v2246_v1  ;;  %1446 = vmatprep.mubr.bf16.mxu0 %v2246_v1 }
  0xd4   : > { %1845 = vmatmul.mubr.msk.bf16.gmra.mrb[52].mxu1 %vm561_vm2, %v2160_v62  ;;  %1877 = vmatmul.mubr.msk.bf16.gmra.mrb[52].mxu0 %vm561_vm2, %v2161_v63 }
  0xd5   : > { %1103 = vmatprep.mubr.bf16.mxu1 %v2246_v1  ;;  %1456 = vmatprep.mubr.bf16.mxu0 %v2246_v1 }
  0xdc   : > { %1846 = vmatmul.mubr.msk.bf16.gmra.mrb[56].mxu1 %vm561_vm2, %v2162_v0  ;;  %1878 = vmatmul.mubr.msk.bf16.gmra.mrb[56].mxu0 %vm561_vm2, %v2163_v2 }
  0xdd   : > { %1113 = vmatprep.mubr.bf16.mxu1 %v2246_v1  ;;  %1466 = vmatprep.mubr.bf16.mxu0 %v2246_v1 }
  0xe4   : > { %1847 = vmatmul.mubr.msk.bf16.gmra.mrb[60].mxu1 %vm561_vm2, %v2164_v3  ;;  %1879 = vmatmul.mubr.msk.bf16.gmra.mrb[60].mxu0 %vm561_vm2, %v2165_v4 }
  0xff   : > { %v644_v5 = vpop.f32.mrb[0].mxu1 }
 0x100   : > { %v646_v6 = vpop.f32.mrb[1].mxu1 }
 0x101   : > { %v648_v7 = vpop.f32.mrb[2].mxu1 }
 0x102   : > { %v650_v8 = vpop.f32.mrb[3].mxu1 }
 0x107   : > { %v654_v9 = vpop.f32.mrb[4].mxu1 }
 0x108   : > { %v656_v10 = vpop.f32.mrb[5].mxu1 }
 0x109   : > { %v658_v11 = vpop.f32.mrb[6].mxu1 }
 0x10a   : > { %v660_v12 = vpop.f32.mrb[7].mxu1 }
 0x10f   : > { %v664_v13 = vpop.f32.mrb[8].mxu1 }
 0x110   : > { %v666_v14 = vpop.f32.mrb[9].mxu1 }
 0x111   : > { %v668_v15 = vpop.f32.mrb[10].mxu1 }
 0x112   : > { %v670_v16 = vpop.f32.mrb[11].mxu1 }
 0x117   : > { %v674_v17 = vpop.f32.mrb[12].mxu1 }
 0x118   : > { %v676_v1 = vpop.f32.mrb[13].mxu1 }
 0x119   : > { %v2572_v18 = vpop.f32.mrb[14].mxu1 }
 0x11a   : > { %v2574_v19 = vpop.f32.mrb[15].mxu1 }
 0x11f   : > { %v2576_v20 = vpop.f32.mrb[16].mxu1 }
 0x120   : > { %v2578_v21 = vpop.f32.mrb[17].mxu1 }
 0x121   : > { %v2580_v22 = vpop.f32.mrb[18].mxu1 }
 0x122   : > { %v2582_v23 = vpop.f32.mrb[19].mxu1 }
 0x127   : > { %v2584_v24 = vpop.f32.mrb[20].mxu1 }
 0x128   : > { %v2586_v25 = vpop.f32.mrb[21].mxu1 }
 0x129   : > { %v2588_v26 = vpop.f32.mrb[22].mxu1 }
 0x12a   : > { %v2590_v27 = vpop.f32.mrb[23].mxu1 }
 0x12f   : > { %v2592_v28 = vpop.f32.mrb[24].mxu1 }
 0x130   : > { %v2594_v29 = vpop.f32.mrb[25].mxu1 }
 0x131   : > { %v2596_v30 = vpop.f32.mrb[26].mxu1 }
 0x132   : > { %v2598_v31 = vpop.f32.mrb[27].mxu1 }
 0x137   : > { %v2600_v32 = vpop.f32.mrb[28].mxu1 }
 0x138   : > { %v2602_v33 = vpop.f32.mrb[29].mxu1 }
 0x139   : > { %v2604_v34 = vpop.f32.mrb[30].mxu1 }
 0x13a   : > { %v2607_v35 = vpop.f32.mrb[31].mxu1 }
 0x13f   : > { %v1318_v36 = vpop.f32.mrb[0].mxu0 }
 0x140   : > { %v1931_v37 = vadd.f32 %v1318_v36, %v644_v5  ;;  %v1320_v38 = vpop.f32.mrb[1].mxu0 }
 0x141   : > { %v1932_v39 = vadd.f32 %v1320_v38, %v646_v6  ;;  %v1322_v40 = vpop.f32.mrb[2].mxu0 }
 0x142   : > { %1541 = vst [vmem:[%s2611_s30] sm:$0xff] %v1931_v37  ;;  %v1933_v41 = vadd.f32 %v1322_v40, %v648_v7  ;;  %v1324_v42 = vpop.f32.mrb[3].mxu0 }
 0x143   : > { %1542 = vst [vmem:[%s2611_s30 + $0x8] sm:$0xff] %v1932_v39  ;;  %v1934_v43 = vadd.f32 %v1324_v42, %v650_v8 }
 0x144   : > { %1543 = vst [vmem:[%s2611_s30 + $0x10] sm:$0xff] %v1933_v41 }
 0x145   : > { %1544 = vst [vmem:[%s2611_s30 + $0x18] sm:$0xff] %v1934_v43 }
 0x147   : > { %v1328_v44 = vpop.f32.mrb[4].mxu0 }
 0x148   : > { %v1935_v45 = vadd.f32 %v1328_v44, %v654_v9  ;;  %v1330_v46 = vpop.f32.mrb[5].mxu0 }
 0x149   : > { %v1936_v47 = vadd.f32 %v1330_v46, %v656_v10  ;;  %v1332_v48 = vpop.f32.mrb[6].mxu0 }
 0x14a   : > { %1545 = vst [vmem:[%s2611_s30 + $0x20] sm:$0xff] %v1935_v45  ;;  %v1937_v49 = vadd.f32 %v1332_v48, %v658_v11  ;;  %v1334_v50 = vpop.f32.mrb[7].mxu0 }
 0x14b   : > { %1546 = vst [vmem:[%s2611_s30 + $0x28] sm:$0xff] %v1936_v47  ;;  %v1938_v51 = vadd.f32 %v1334_v50, %v660_v12 }
 0x14c   : > { %1547 = vst [vmem:[%s2611_s30 + $0x30] sm:$0xff] %v1937_v49 }
 0x14d   : > { %1548 = vst [vmem:[%s2611_s30 + $0x38] sm:$0xff] %v1938_v51 }
 0x14f   : > { %v1338_v52 = vpop.f32.mrb[8].mxu0 }
 0x150   : > { %v1939_v53 = vadd.f32 %v1338_v52, %v664_v13  ;;  %v1340_v54 = vpop.f32.mrb[9].mxu0 }
 0x151   : > { %v1940_v55 = vadd.f32 %v1340_v54, %v666_v14  ;;  %v1342_v56 = vpop.f32.mrb[10].mxu0 }
 0x152   : > { %1549 = vst [vmem:[%s2611_s30 + $0x40] sm:$0xff] %v1939_v53  ;;  %v1941_v57 = vadd.f32 %v1342_v56, %v668_v15  ;;  %v1344_v58 = vpop.f32.mrb[11].mxu0 }
 0x153   : > { %1550 = vst [vmem:[%s2611_s30 + $0x48] sm:$0xff] %v1940_v55  ;;  %v1942_v59 = vadd.f32 %v1344_v58, %v670_v16 }
 0x154   : > { %1551 = vst [vmem:[%s2611_s30 + $0x50] sm:$0xff] %v1941_v57 }
 0x155   : > { %1552 = vst [vmem:[%s2611_s30 + $0x58] sm:$0xff] %v1942_v59 }
 0x157   : > { %v1348_v60 = vpop.f32.mrb[12].mxu0 }
 0x158   : > { %v1943_v61 = vadd.f32 %v1348_v60, %v674_v17  ;;  %v1350_v62 = vpop.f32.mrb[13].mxu0 }
 0x159   : > { %v1944_v63 = vadd.f32 %v1350_v62, %v676_v1  ;;  %v1352_v0 = vpop.f32.mrb[14].mxu0 }
 0x15a   : > { %1553 = vst [vmem:[%s2611_s30 + $0x60] sm:$0xff] %v1943_v61  ;;  %v1945_v2 = vadd.f32 %v1352_v0, %v2572_v18  ;;  %v1354_v3 = vpop.f32.mrb[15].mxu0 }
 0x15b   : > { %1554 = vst [vmem:[%s2611_s30 + $0x68] sm:$0xff] %v1944_v63  ;;  %v1946_v4 = vadd.f32 %v1354_v3, %v2574_v19 }
 0x15c   : > { %1555 = vst [vmem:[%s2611_s30 + $0x70] sm:$0xff] %v1945_v2 }
 0x15d   : > { %1556 = vst [vmem:[%s2611_s30 + $0x78] sm:$0xff] %v1946_v4 }
 0x15f   : > { %v1358_v5 = vpop.f32.mrb[16].mxu0 }
 0x160   : > { %v1947_v6 = vadd.f32 %v1358_v5, %v2576_v20  ;;  %v1360_v7 = vpop.f32.mrb[17].mxu0 }
 0x161   : > { %v1948_v8 = vadd.f32 %v1360_v7, %v2578_v21  ;;  %v1362_v9 = vpop.f32.mrb[18].mxu0 }
 0x162   : > { %1557 = vst [vmem:[%s2611_s30 + $0x80] sm:$0xff] %v1947_v6  ;;  %v1949_v10 = vadd.f32 %v1362_v9, %v2580_v22  ;;  %v1364_v11 = vpop.f32.mrb[19].mxu0 }
 0x163   : > { %1558 = vst [vmem:[%s2611_s30 + $0x88] sm:$0xff] %v1948_v8  ;;  %v1950_v12 = vadd.f32 %v1364_v11, %v2582_v23 }
 0x164   : > { %1559 = vst [vmem:[%s2611_s30 + $0x90] sm:$0xff] %v1949_v10 }
 0x165   : > { %1560 = vst [vmem:[%s2611_s30 + $0x98] sm:$0xff] %v1950_v12 }
 0x167   : > { %v1368_v13 = vpop.f32.mrb[20].mxu0 }
 0x168   : > { %v1951_v14 = vadd.f32 %v1368_v13, %v2584_v24  ;;  %v1370_v15 = vpop.f32.mrb[21].mxu0 }
 0x169   : > { %v1952_v16 = vadd.f32 %v1370_v15, %v2586_v25  ;;  %v1372_v17 = vpop.f32.mrb[22].mxu0 }
 0x16a   : > { %1561 = vst [vmem:[%s2611_s30 + $0xa0] sm:$0xff] %v1951_v14  ;;  %v1953_v1 = vadd.f32 %v1372_v17, %v2588_v26  ;;  %v1374_v18 = vpop.f32.mrb[23].mxu0 }
 0x16b   : > { %1562 = vst [vmem:[%s2611_s30 + $0xa8] sm:$0xff] %v1952_v16  ;;  %v1954_v19 = vadd.f32 %v1374_v18, %v2590_v27 }
 0x16c   : > { %1563 = vst [vmem:[%s2611_s30 + $0xb0] sm:$0xff] %v1953_v1 }
 0x16d   : > { %1564 = vst [vmem:[%s2611_s30 + $0xb8] sm:$0xff] %v1954_v19 }
 0x16f   : > { %v1378_v20 = vpop.f32.mrb[24].mxu0 }
 0x170   : > { %v1955_v21 = vadd.f32 %v1378_v20, %v2592_v28  ;;  %v1380_v22 = vpop.f32.mrb[25].mxu0 }
 0x171   : > { %v1956_v23 = vadd.f32 %v1380_v22, %v2594_v29  ;;  %v1382_v24 = vpop.f32.mrb[26].mxu0 }
 0x172   : > { %1565 = vst [vmem:[%s2611_s30 + $0xc0] sm:$0xff] %v1955_v21  ;;  %v1957_v25 = vadd.f32 %v1382_v24, %v2596_v30  ;;  %v1384_v26 = vpop.f32.mrb[27].mxu0 }
 0x173   : > { %1566 = vst [vmem:[%s2611_s30 + $0xc8] sm:$0xff] %v1956_v23  ;;  %v1958_v27 = vadd.f32 %v1384_v26, %v2598_v31 }
 0x174   : > { %1567 = vst [vmem:[%s2611_s30 + $0xd0] sm:$0xff] %v1957_v25 }
 0x175   : > { %1568 = vst [vmem:[%s2611_s30 + $0xd8] sm:$0xff] %v1958_v27 }
 0x177   : > { %v1388_v36 = vpop.f32.mrb[28].mxu0 }
 0x178   : > { %v1959_v28 = vadd.f32 %v1388_v36, %v2600_v32  ;;  %v1390_v37 = vpop.f32.mrb[29].mxu0 }
 0x179   : > { %v1960_v38 = vadd.f32 %v1390_v37, %v2602_v33  ;;  %v1392_v29 = vpop.f32.mrb[30].mxu0 }
 0x17a   : > { %1569 = vst [vmem:[%s2611_s30 + $0xe0] sm:$0xff] %v1959_v28  ;;  %v1961_v39 = vadd.f32 %v1392_v29, %v2604_v34  ;;  %v1394_v30 = vpop.f32.mrb[31].mxu0 }
 0x17b   : > { %1570 = vst [vmem:[%s2611_s30 + $0xe8] sm:$0xff] %v1960_v38  ;;  %v1962_v40 = vadd.f32 %v1394_v30, %v2607_v35 }
 0x17c   : > { %1571 = vst [vmem:[%s2611_s30 + $0xf0] sm:$0xff] %v1961_v39 }
 0x17d   : > { %1572 = vst [vmem:[%s2611_s30 + $0xf8] sm:$0xff] %v1962_v40 }
 0x17f   : > { %v1045_v31 = vpop.f32.mrb[32].mxu1  ;;  %v1398_v41 = vpop.f32.mrb[32].mxu0 }
 0x180   : > { %v1963_v32 = vadd.f32 %v1398_v41, %v1045_v31  ;;  %v1047_v42 = vpop.f32.mrb[33].mxu1  ;;  %v1400_v43 = vpop.f32.mrb[33].mxu0 }
 0x181   : > { %v1964_v33 = vadd.f32 %v1400_v43, %v1047_v42  ;;  %v1049_v44 = vpop.f32.mrb[34].mxu1  ;;  %v1402_v45 = vpop.f32.mrb[34].mxu0 }
 0x182   : > { %1573 = vst [vmem:[%s2611_s30 + $0x100] sm:$0xff] %v1963_v32  ;;  %v1965_v34 = vadd.f32 %v1402_v45, %v1049_v44  ;;  %v1051_v46 = vpop.f32.mrb[35].mxu1  ;;  %v1404_v47 = vpop.f32.mrb[35].mxu0 }
 0x183   : > { %1574 = vst [vmem:[%s2611_s30 + $0x108] sm:$0xff] %v1964_v33  ;;  %v1966_v35 = vadd.f32 %v1404_v47, %v1051_v46 }
 0x184   : > { %1575 = vst [vmem:[%s2611_s30 + $0x110] sm:$0xff] %v1965_v34 }
 0x185   : > { %1576 = vst [vmem:[%s2611_s30 + $0x118] sm:$0xff] %v1966_v35 }
 0x187   : > { %v1055_v48 = vpop.f32.mrb[36].mxu1  ;;  %v1408_v49 = vpop.f32.mrb[36].mxu0 }
 0x188   : > { %v1967_v50 = vadd.f32 %v1408_v49, %v1055_v48  ;;  %v1057_v51 = vpop.f32.mrb[37].mxu1  ;;  %v1410_v52 = vpop.f32.mrb[37].mxu0 }
 0x189   : > { %v1968_v53 = vadd.f32 %v1410_v52, %v1057_v51  ;;  %v1059_v54 = vpop.f32.mrb[38].mxu1  ;;  %v1412_v55 = vpop.f32.mrb[38].mxu0 }
 0x18a   : > { %1577 = vst [vmem:[%s2611_s30 + $0x120] sm:$0xff] %v1967_v50  ;;  %v1969_v56 = vadd.f32 %v1412_v55, %v1059_v54  ;;  %v1061_v57 = vpop.f32.mrb[39].mxu1  ;;  %v1414_v58 = vpop.f32.mrb[39].mxu0 }
 0x18b   : > { %1578 = vst [vmem:[%s2611_s30 + $0x128] sm:$0xff] %v1968_v53  ;;  %v1970_v59 = vadd.f32 %v1414_v58, %v1061_v57 }
 0x18c   : > { %1579 = vst [vmem:[%s2611_s30 + $0x130] sm:$0xff] %v1969_v56 }
 0x18d   : > { %1580 = vst [vmem:[%s2611_s30 + $0x138] sm:$0xff] %v1970_v59 }
 0x18f   : > { %v1065_v60 = vpop.f32.mrb[40].mxu1  ;;  %v1418_v61 = vpop.f32.mrb[40].mxu0 }
 0x190   : > { %v1971_v62 = vadd.f32 %v1418_v61, %v1065_v60  ;;  %v1067_v63 = vpop.f32.mrb[41].mxu1  ;;  %v1420_v0 = vpop.f32.mrb[41].mxu0 }
 0x191   : > { %v1972_v2 = vadd.f32 %v1420_v0, %v1067_v63  ;;  %v1069_v3 = vpop.f32.mrb[42].mxu1  ;;  %v1422_v4 = vpop.f32.mrb[42].mxu0 }
 0x192   : > { %1581 = vst [vmem:[%s2611_s30 + $0x140] sm:$0xff] %v1971_v62  ;;  %v1973_v5 = vadd.f32 %v1422_v4, %v1069_v3  ;;  %v1071_v6 = vpop.f32.mrb[43].mxu1  ;;  %v1424_v7 = vpop.f32.mrb[43].mxu0 }
 0x193   : > { %1582 = vst [vmem:[%s2611_s30 + $0x148] sm:$0xff] %v1972_v2  ;;  %v1974_v8 = vadd.f32 %v1424_v7, %v1071_v6 }
 0x194   : > { %1583 = vst [vmem:[%s2611_s30 + $0x150] sm:$0xff] %v1973_v5 }
 0x195   : > { %1584 = vst [vmem:[%s2611_s30 + $0x158] sm:$0xff] %v1974_v8 }
 0x197   : > { %v1075_v9 = vpop.f32.mrb[44].mxu1  ;;  %v1428_v10 = vpop.f32.mrb[44].mxu0 }
 0x198   : > { %v1975_v11 = vadd.f32 %v1428_v10, %v1075_v9  ;;  %v1077_v12 = vpop.f32.mrb[45].mxu1  ;;  %v1430_v13 = vpop.f32.mrb[45].mxu0 }
 0x199   : > { %v1976_v14 = vadd.f32 %v1430_v13, %v1077_v12  ;;  %v1079_v15 = vpop.f32.mrb[46].mxu1  ;;  %v1432_v16 = vpop.f32.mrb[46].mxu0 }
 0x19a   : > { %1585 = vst [vmem:[%s2611_s30 + $0x160] sm:$0xff] %v1975_v11  ;;  %v1977_v17 = vadd.f32 %v1432_v16, %v1079_v15  ;;  %v1081_v1 = vpop.f32.mrb[47].mxu1  ;;  %v1434_v18 = vpop.f32.mrb[47].mxu0 }
 0x19b   : > { %1586 = vst [vmem:[%s2611_s30 + $0x168] sm:$0xff] %v1976_v14  ;;  %v1978_v19 = vadd.f32 %v1434_v18, %v1081_v1 }
 0x19c   : > { %1587 = vst [vmem:[%s2611_s30 + $0x170] sm:$0xff] %v1977_v17 }
 0x19d   : > { %1588 = vst [vmem:[%s2611_s30 + $0x178] sm:$0xff] %v1978_v19 }
 0x19f   : > { %v1085_v20 = vpop.f32.mrb[48].mxu1  ;;  %v1438_v21 = vpop.f32.mrb[48].mxu0 }
 0x1a0   : > { %v1979_v22 = vadd.f32 %v1438_v21, %v1085_v20  ;;  %v1087_v23 = vpop.f32.mrb[49].mxu1  ;;  %v1440_v24 = vpop.f32.mrb[49].mxu0 }
 0x1a1   : > { %v1980_v25 = vadd.f32 %v1440_v24, %v1087_v23  ;;  %v1089_v26 = vpop.f32.mrb[50].mxu1  ;;  %v1442_v27 = vpop.f32.mrb[50].mxu0 }
 0x1a2   : > { %1589 = vst [vmem:[%s2611_s30 + $0x180] sm:$0xff] %v1979_v22  ;;  %v1981_v36 = vadd.f32 %v1442_v27, %v1089_v26  ;;  %v1091_v28 = vpop.f32.mrb[51].mxu1  ;;  %v1444_v37 = vpop.f32.mrb[51].mxu0 }
 0x1a3   : > { %1590 = vst [vmem:[%s2611_s30 + $0x188] sm:$0xff] %v1980_v25  ;;  %v1982_v38 = vadd.f32 %v1444_v37, %v1091_v28 }
 0x1a4   : > { %1591 = vst [vmem:[%s2611_s30 + $0x190] sm:$0xff] %v1981_v36 }
 0x1a5   : > { %1592 = vst [vmem:[%s2611_s30 + $0x198] sm:$0xff] %v1982_v38 }
 0x1a7   : > { %v1095_v29 = vpop.f32.mrb[52].mxu1  ;;  %v1448_v39 = vpop.f32.mrb[52].mxu0 }
 0x1a8   : > { %v1983_v30 = vadd.f32 %v1448_v39, %v1095_v29  ;;  %v1097_v40 = vpop.f32.mrb[53].mxu1  ;;  %v1450_v31 = vpop.f32.mrb[53].mxu0 }
 0x1a9   : > { %v1984_v41 = vadd.f32 %v1450_v31, %v1097_v40  ;;  %v1099_v32 = vpop.f32.mrb[54].mxu1  ;;  %v1452_v42 = vpop.f32.mrb[54].mxu0 }
 0x1aa   : > { %1593 = vst [vmem:[%s2611_s30 + $0x1a0] sm:$0xff] %v1983_v30  ;;  %v1985_v43 = vadd.f32 %v1452_v42, %v1099_v32  ;;  %v1101_v33 = vpop.f32.mrb[55].mxu1  ;;  %v1454_v44 = vpop.f32.mrb[55].mxu0 }
 0x1ab   : > { %1594 = vst [vmem:[%s2611_s30 + $0x1a8] sm:$0xff] %v1984_v41  ;;  %v1986_v45 = vadd.f32 %v1454_v44, %v1101_v33 }
 0x1ac   : > { %1595 = vst [vmem:[%s2611_s30 + $0x1b0] sm:$0xff] %v1985_v43 }
 0x1ad   : > { %1596 = vst [vmem:[%s2611_s30 + $0x1b8] sm:$0xff] %v1986_v45 }
 0x1af   : > { %v1105_v34 = vpop.f32.mrb[56].mxu1  ;;  %v1458_v46 = vpop.f32.mrb[56].mxu0 }
 0x1b0   : > { %v1987_v47 = vadd.f32 %v1458_v46, %v1105_v34  ;;  %v1107_v35 = vpop.f32.mrb[57].mxu1  ;;  %v1460_v48 = vpop.f32.mrb[57].mxu0 }
 0x1b1   : > { %v1988_v49 = vadd.f32 %v1460_v48, %v1107_v35  ;;  %v1109_v50 = vpop.f32.mrb[58].mxu1  ;;  %v1462_v51 = vpop.f32.mrb[58].mxu0 }
 0x1b2   : > { %1597 = vst [vmem:[%s2611_s30 + $0x1c0] sm:$0xff] %v1987_v47  ;;  %v1989_v52 = vadd.f32 %v1462_v51, %v1109_v50  ;;  %v1111_v53 = vpop.f32.mrb[59].mxu1  ;;  %v1464_v54 = vpop.f32.mrb[59].mxu0 }
 0x1b3   : > { %1598 = vst [vmem:[%s2611_s30 + $0x1c8] sm:$0xff] %v1988_v49  ;;  %v1990_v55 = vadd.f32 %v1464_v54, %v1111_v53 }
 0x1b4   : > { %1599 = vst [vmem:[%s2611_s30 + $0x1d0] sm:$0xff] %v1989_v52 }
 0x1b5   : > { %1600 = vst [vmem:[%s2611_s30 + $0x1d8] sm:$0xff] %v1990_v55 }
 0x1b7   : > { %v1115_v56 = vpop.f32.mrb[60].mxu1  ;;  %v1468_v57 = vpop.f32.mrb[60].mxu0 }
 0x1b8   : > { %v1991_v58 = vadd.f32 %v1468_v57, %v1115_v56  ;;  %v1117_v59 = vpop.f32.mrb[61].mxu1  ;;  %v1470_v60 = vpop.f32.mrb[61].mxu0 }
 0x1b9   : > { %v1992_v61 = vadd.f32 %v1470_v60, %v1117_v59  ;;  %v1119_v62 = vpop.f32.mrb[62].mxu1  ;;  %v1472_v63 = vpop.f32.mrb[62].mxu0 }
 0x1ba   : > { %1601 = vst [vmem:[%s2611_s30 + $0x1e0] sm:$0xff] %v1991_v58  ;;  %v1993_v0 = vadd.f32 %v1472_v63, %v1119_v62  ;;  %v1121_v2 = vpop.f32.mrb[63].mxu1  ;;  %v1474_v3 = vpop.f32.mrb[63].mxu0 }
 0x1bb   : > { %1602 = vst [vmem:[%s2611_s30 + $0x1e8] sm:$0xff] %v1992_v61  ;;  %v1994_v4 = vadd.f32 %v1474_v3, %v1121_v2 }
 0x1bc   : > { %1603 = vst [vmem:[%s2611_s30 + $0x1f0] sm:$0xff] %v1993_v0 }
 0x1bd   : > { %1604 = vst [vmem:[%s2611_s30 + $0x1f8] sm:$0xff] %v1994_v4 }
 0x1be   : > { %2179 = shalt.err (!%p2176_p5)
}
 0x1bf   : > { %s2180_s14 = scalar_lea.hbm %s2697_s9, 8192  ;;  %s2184_s24 = scalar_lea.hbm %s2756_s4, 16384 }
 0x1c0   : > { %p2181_p6 = scmp.ne.s32.totalorder %s2697_s9, %s2180_s14  ;;  %p2185_p10 = scmp.lt.u32.totalorder %s2697_s9, %s2756_s4 }
 0x1c1   : > { %p2186_p11 = scmp.lt.u32.totalorder %s2184_s24, %s2180_s14  ;;  %p2188_p13 = scmp.lt.u32.totalorder %s2180_s14, %s2697_s9 }
 0x1c2   : > { %p2182_p7 = pnand %p2181_p6, %p2316_p4 }
 0x1c3   : > { %p2187_p12 = por %p2186_p11, %p2185_p10 }
 0x1c4   : > { %p2183_p9 = pneg %p2182_p7 }
 0x1c5   : > { %p2189_p0 = por %p2188_p13, %p2187_p12 }
 0x1c7   : > { %p2190_p1 = pnand %p2189_p0, %p2183_p9 }
 0x1c9   : > { %2193 = shalt.err (!%p2190_p1)
}
 0x1ca   : > { %s2249_s30 = smov 256   ;;  %s2250_s5 = smov 16  }
 0x1cb   : > { %2059 = dma.vmem_to_hbm [thread:$0]  (%p2316_p4), %s2699_s6, 8192, %s2697_s9, %s2706_s18, %s2249_s30, %s2249_s30, %s2250_s5  }
 0x1cc PF: > { %p2065_p2 = scmp.ge.s32.totalorder %s2244_s20, 2  ;;  %s1639_s7 = sand.u32 1, %s2224_s15  }
 0x1cd   : > { %s1640_s8 = scalar_lea.sflag [#allocation4], %s1639_s7 }
 0x1ce   : > { %p2062_p3 = pnand %p2065_p2, %p2323_p8 }
 0x1d0   : > { %2219 = dma.done.wait (!%p2062_p3), %s1640_s8, 8192  }
 0x1d1   : > { %2221 = vsyncadd (!%p2062_p3), %s1640_s8, 4294959104  ;;  %s17_s20 = sadd.s32 1, %s2244_s20   ;;  %s2771_s15 = smov %s2228_s16 }
 0x1d2   : > { %p14_p5 = scmp.ge.s32.totalorder %s17_s20, 4   ;;  %s2772_s16 = smov %s2232_s17 }
 0x1d3   : > { %s2773_s17 = smov %s2329_s28  ;;  %s2774_s18 = smov %s2240_s19 }
 0x1d4   : > { %s2775_s19 = smov %s2777_s23  ;;  %16 = sbr.rel (!%p14_p5) target bundleno = 4 (0x4), region = 84 }
 0x1db   :  { %1645 = vsyncpa [#allocation4], 1 }
 0x1dc   :  { %1647 = vsyncpa [#allocation4 + $0x1], 1 }

</bundles_post_ra>
